<compile_context>
chip_gen: v6e
topology: v6e:2x2x1
jax: 0.10.0
libtpu: 0.0.40
codegen_flags: <defaults>
</compile_context>

<pallas_src>
import jax
import jax.numpy as jnp
from jax.experimental import pallas as pl
from jax.experimental.pallas import tpu as pltpu

LANE = 128
SUBLANE = 8


def _round_up(n, m):
    return ((n + m - 1) // m) * m


def fc_kernel(x_ref, w1_ref, b1_ref, w2_ref, b2_ref, o_ref):
    # x_ref:  [TB, in_dim]  caller dtype (cast to bf16 on the VPU; mem-bound kernel)
    # w1_ref: [in_dim, hid_p] bf16      b1_ref: [1, hid_p] f32
    # w2_ref: [hid_p, out_p] bf16       b2_ref: [1, out_p] f32
    # o_ref:  [TB, out_p] bf16 (lane-dense slab)
    x = x_ref[...].astype(jnp.bfloat16)
    h = jnp.dot(x, w1_ref[...], preferred_element_type=jnp.float32)      # MXU, f32 acc
    h = jnp.maximum(h + b1_ref[...], 0.0)                                # bias+ReLU in f32
    y = jnp.dot(h.astype(jnp.bfloat16), w2_ref[...],
                preferred_element_type=jnp.float32)                      # MXU, f32 acc
    o_ref[...] = jnp.maximum(y + b2_ref[...], 0.0).astype(o_ref.dtype)   # final ReLU (module spec)


def fc_forward(x_nchw, w1, b1, w2, b2, *, block_b=1024):
    """x_nchw: [B, C, H, W] with C*H*W == w1.shape[0]. w1: [784, H], b1: [H],
    w2: [H, 10], b2: [10]. Returns [B, 10] float32."""
    B = x_nchw.shape[0]
    x = x_nchw.reshape(B, -1)            # view-like reshape; NO dtype round-trip in HBM
    in_dim = x.shape[1]
    hidden = w1.shape[1]
    out_dim = w2.shape[1]

    # Lane-aligned padded dims for the (tiny) weights / outputs only.
    hid_p = _round_up(hidden, LANE)      # 128 -> 128
    out_p = _round_up(out_dim, LANE)     # 10  -> 128

    # Adaptive batch tile:
    #  - enough blocks to keep the tile <= block_b,
    #  - at least 2 blocks when the batch is big enough (v7x megacore: the
    #    "parallel" axis shards grid *steps*, so grid=(1,) leaves one TC idle),
    #  - tile rounded to a sublane so batch padding is < 8 rows per block.
    n_blocks = pl.cdiv(B, block_b)
    if B >= 2 * SUBLANE:
        n_blocks = max(n_blocks, 2)
    TB = _round_up(pl.cdiv(B, n_blocks), SUBLANE)
    B_p = n_blocks * TB

    # Pad only the batch axis (at most 7 rows per block); x keeps its dtype and
    # its natural 784-wide layout — no lane padding, no bf16 staging copy.
    if B_p != B:
        x = jnp.zeros((B_p, in_dim), x.dtype).at[:B].set(x)

    # One-time tiny weight/bias padding + bf16 cast (biases stay f32 for the epilogue).
    w1_p = jnp.zeros((in_dim, hid_p), jnp.bfloat16).at[:, :hidden].set(w1.astype(jnp.bfloat16))
    b1_p = jnp.zeros((1, hid_p), jnp.float32).at[:, :hidden].set(
        b1.reshape(1, -1).astype(jnp.float32))
    w2_p = jnp.zeros((hid_p, out_p), jnp.bfloat16).at[:hidden, :out_dim].set(
        w2.astype(jnp.bfloat16))
    b2_p = jnp.zeros((1, out_p), jnp.float32).at[:, :out_dim].set(
        b2.reshape(1, -1).astype(jnp.float32))

    grid = (n_blocks,)
    x_bytes = jnp.dtype(x.dtype).itemsize

    out_padded = pl.pallas_call(
        fc_kernel,
        out_shape=jax.ShapeDtypeStruct((B_p, out_p), jnp.bfloat16),
        grid=grid,
        in_specs=[
            pl.BlockSpec((TB, in_dim), lambda i: (i, 0)),     # batch-tiled activations (full 784 width)
            pl.BlockSpec((in_dim, hid_p), lambda i: (0, 0)),  # W1 resident in VMEM
            pl.BlockSpec((1, hid_p), lambda i: (0, 0)),       # b1 resident
            pl.BlockSpec((hid_p, out_p), lambda i: (0, 0)),   # W2 resident
            pl.BlockSpec((1, out_p), lambda i: (0, 0)),       # b2 resident
        ],
        out_specs=pl.BlockSpec((TB, out_p), lambda i: (i, 0)),  # lane-dense bf16 output slab
        compiler_params=pltpu.CompilerParams(
            dimension_semantics=("parallel",),
            vmem_limit_bytes=32 * 1024 * 1024,   # headroom for block_b sweeps (v5e default is 16 MiB)
        ),
        cost_estimate=pl.CostEstimate(
            flops=2 * B_p * (in_dim * hid_p + hid_p * out_p),
            transcendentals=0,
            bytes_accessed=(B_p * in_dim * x_bytes          # activations, read once in caller dtype
                            + in_dim * hid_p * 2 + hid_p * out_p * 2   # resident bf16 weights
                            + B_p * out_p * 2),             # bf16 output slab
        ),
    )(x, w1_p, b1_p, w2_p, b2_p)

    return out_padded[:B, :out_dim].astype(jnp.float32)


def init_fc_params(key, hidden_dim=128):
    """Deterministic init mimicking torch.nn.Linear default (uniform +-1/sqrt(fan_in)).
    Weights stored as [in, out] (transposed relative to torch's [out, in])."""
    k1, k2, k3, k4 = jax.random.split(key, 4)
    in1 = 28 * 28
    bound1 = 1.0 / jnp.sqrt(in1)
    bound2 = 1.0 / jnp.sqrt(hidden_dim)
    w1 = jax.random.uniform(k1, (in1, hidden_dim), jnp.float32, -bound1, bound1)
    b1 = jax.random.uniform(k2, (hidden_dim,), jnp.float32, -bound1, bound1)
    w2 = jax.random.uniform(k3, (hidden_dim, 10), jnp.float32, -bound2, bound2)
    b2 = jax.random.uniform(k4, (10,), jnp.float32, -bound2, bound2)
    return w1, b1, w2, b2


if __name__ == "__main__":
    key = jax.random.PRNGKey(0)
    k_x, k_p = jax.random.split(key)

    # Small batch; spatial dims fixed by the module (Linear(28*28, ...)),
    # hidden_dim=128 matches the PyTorch module default.
    B, C, H, W = 2, 1, 28, 28
    hidden_dim = 128
    x = jax.random.normal(k_x, (B, C, H, W), jnp.float32)

    w1, b1, w2, b2 = init_fc_params(k_p, hidden_dim=hidden_dim)

    out = fc_forward(x, w1, b1, w2, b2)
    out = jax.block_until_ready(out)

    # Reference in plain f32 JAX (module semantics: relu(l2(relu(l1(x.view(B,-1)))))).
    # bf16 matmul operands + bf16 output slab with f32 accumulation -> relaxed tolerance.
    x_flat = x.reshape(B, -1)
    ref = jnp.maximum(jnp.maximum(x_flat @ w1 + b1[None, :], 0.0) @ w2 + b2[None, :], 0.0)
    assert out.shape == (B, 10)
    assert jnp.allclose(out, ref, atol=3e-2, rtol=3e-2), (
        f"max abs err = {jnp.max(jnp.abs(out - ref))}")

    print("KERNEL_OK")
</pallas_src>

<mosaic_0001>
module attributes {stable_mosaic.version = 11 : i64} {
  func.func @fc_kernel(%arg0: i32, %arg1: memref<8x784xf32, #tpu.memory_space<vmem>>, %arg2: memref<784x128xbf16, #tpu.memory_space<vmem>>, %arg3: memref<1x128xf32, #tpu.memory_space<vmem>>, %arg4: memref<128x128xbf16, #tpu.memory_space<vmem>>, %arg5: memref<1x128xf32, #tpu.memory_space<vmem>>, %arg6: memref<8x128xbf16, #tpu.memory_space<vmem>>) attributes {dimension_semantics = [#tpu.dimension_semantics<parallel>], iteration_bounds = array<i64: 1>, scalar_prefetch = 0 : i64, scratch_operands = 0 : i64, tpu.core_type = #tpu.core_type<tc>, window_params = [{transform_indices = @transform_0, window_bounds = array<i64: 8, 784>}, {pipeline_mode = #tpu.pipeline_mode<synchronous>, transform_indices = @transform_1, window_bounds = array<i64: 784, 128>}, {pipeline_mode = #tpu.pipeline_mode<synchronous>, transform_indices = @transform_2, window_bounds = array<i64: 1, 128>}, {pipeline_mode = #tpu.pipeline_mode<synchronous>, transform_indices = @transform_3, window_bounds = array<i64: 128, 128>}, {pipeline_mode = #tpu.pipeline_mode<synchronous>, transform_indices = @transform_4, window_bounds = array<i64: 1, 128>}, {transform_indices = @transform_5, window_bounds = array<i64: 8, 128>}]} {
    %c0 = arith.constant 0 : index
    %c0_0 = arith.constant 0 : index
    %0 = vector.load %arg1[%c0, %c0_0] : memref<8x784xf32, #tpu.memory_space<vmem>>, vector<8x784xf32>
    %1 = arith.truncf %0 : vector<8x784xf32> to vector<8x784xbf16>
    %c0_1 = arith.constant 0 : index
    %c0_2 = arith.constant 0 : index
    %2 = vector.load %arg2[%c0_1, %c0_2] : memref<784x128xbf16, #tpu.memory_space<vmem>>, vector<784x128xbf16>
    %cst = arith.constant dense<0.000000e+00> : vector<8x128xf32>
    %3 = tpu.matmul %1, %2, %cst {dimension_numbers = #tpu.dot_dimension_numbers<[1], [0], [0], [1], [0, 0, 1, 1], [], []>} : vector<8x784xbf16>, vector<784x128xbf16>, vector<8x128xf32> -> vector<8x128xf32>
    %c0_3 = arith.constant 0 : index
    %c0_4 = arith.constant 0 : index
    %4 = vector.load %arg3[%c0_3, %c0_4] : memref<1x128xf32, #tpu.memory_space<vmem>>, vector<1x128xf32>
    %5 = vector.broadcast %4 : vector<1x128xf32> to vector<8x128xf32>
    %6 = arith.addf %3, %5 : vector<8x128xf32>
    %cst_5 = arith.constant 0.000000e+00 : f32
    %7 = vector.broadcast %cst_5 : f32 to vector<8x128xf32>
    %8 = arith.maximumf %6, %7 : vector<8x128xf32>
    %9 = arith.truncf %8 : vector<8x128xf32> to vector<8x128xbf16>
    %c0_6 = arith.constant 0 : index
    %c0_7 = arith.constant 0 : index
    %10 = vector.load %arg4[%c0_6, %c0_7] : memref<128x128xbf16, #tpu.memory_space<vmem>>, vector<128x128xbf16>
    %cst_8 = arith.constant dense<0.000000e+00> : vector<8x128xf32>
    %11 = tpu.matmul %9, %10, %cst_8 {dimension_numbers = #tpu.dot_dimension_numbers<[1], [0], [0], [1], [0, 0, 1, 1], [], []>} : vector<8x128xbf16>, vector<128x128xbf16>, vector<8x128xf32> -> vector<8x128xf32>
    %c0_9 = arith.constant 0 : index
    %c0_10 = arith.constant 0 : index
    %12 = vector.load %arg5[%c0_9, %c0_10] : memref<1x128xf32, #tpu.memory_space<vmem>>, vector<1x128xf32>
    %13 = vector.broadcast %12 : vector<1x128xf32> to vector<8x128xf32>
    %14 = arith.addf %11, %13 : vector<8x128xf32>
    %cst_11 = arith.constant 0.000000e+00 : f32
    %15 = vector.broadcast %cst_11 : f32 to vector<8x128xf32>
    %16 = arith.maximumf %14, %15 : vector<8x128xf32>
    %17 = arith.truncf %16 : vector<8x128xf32> to vector<8x128xbf16>
    %c0_12 = arith.constant 0 : index
    %c0_13 = arith.constant 0 : index
    %18 = vector.load %arg6[%c0_12, %c0_13] : memref<8x128xbf16, #tpu.memory_space<vmem>>, vector<8x128xbf16>
    tpu.vector_store %arg6[%c0_12, %c0_13], %17 {strides = array<i32>} : memref<8x128xbf16, #tpu.memory_space<vmem>>, vector<8x128xbf16>,
    return
  }
  func.func @transform_0(%arg0: i32) -> (i32, i32) {
    %c0_i32 = arith.constant 0 : i32
    %c0_i32_0 = arith.constant 0 : i32
    return %arg0, %c0_i32 : i32, i32
  }
  func.func @transform_1(%arg0: i32) -> (i32, i32) {
    %c0_i32 = arith.constant 0 : i32
    %c0_i32_0 = arith.constant 0 : i32
    %c0_i32_1 = arith.constant 0 : i32
    return %c0_i32, %c0_i32_0 : i32, i32
  }
  func.func @transform_2(%arg0: i32) -> (i32, i32) {
    %c0_i32 = arith.constant 0 : i32
    %c0_i32_0 = arith.constant 0 : i32
    %c0_i32_1 = arith.constant 0 : i32
    return %c0_i32, %c0_i32_0 : i32, i32
  }
  func.func @transform_3(%arg0: i32) -> (i32, i32) {
    %c0_i32 = arith.constant 0 : i32
    %c0_i32_0 = arith.constant 0 : i32
    %c0_i32_1 = arith.constant 0 : i32
    return %c0_i32, %c0_i32_0 : i32, i32
  }
  func.func @transform_4(%arg0: i32) -> (i32, i32) {
    %c0_i32 = arith.constant 0 : i32
    %c0_i32_0 = arith.constant 0 : i32
    %c0_i32_1 = arith.constant 0 : i32
    return %c0_i32, %c0_i32_0 : i32, i32
  }
  func.func @transform_5(%arg0: i32) -> (i32, i32) {
    %c0_i32 = arith.constant 0 : i32
    %c0_i32_0 = arith.constant 0 : i32
    return %arg0, %c0_i32 : i32, i32
  }
}

</mosaic_0001>

<bundles_post_ra>
// kernel: tpu_custom_call.1
= control target key start
LH: loop header
LB: loop body
LE: loop exit
PB: predicated region body
PF: predicated region fallthrough
CT: control target
= control target key end

     0   :  { %10 = vsyncpa [#allocation3], 0  ;;  %s1153_s0 = inlined_call_operand.hbm [shape: f32[8,784], index: 0, kind: input, shape index: {}]   ;;  %s1154_s1 = inlined_call_operand.hbm [shape: bf16[784,128], index: 1, kind: input, shape index: {}]   ;;  %s1155_s2 = inlined_call_operand.vmem [shape: f32[1,128], index: 2, kind: input, shape index: {}]   ;;  %s1156_s3 = inlined_call_operand.hbm [shape: bf16[128,128], index: 3, kind: input, shape index: {}]   ;;  %s1157_s4 = inlined_call_operand.vmem [shape: f32[1,128], index: 4, kind: input, shape index: {}]   ;;  %s1158_s5 = inlined_call_operand.hbm [shape: bf16[8,128], index: 5, kind: output, shape index: {}]  }
   0x1   :  { %11 = vsyncpa [#allocation6], 0 }
   0x2   :  { %12 = vsyncpa [#allocation4], 0  ;;  %s1084_s18 = smov [#allocation5]  }
   0x3   :  { %s28_s19 = sshll.u32 %s1084_s18, 4  ;;  %s29_s19 = int_to_ptr.vmem [resolvable:$true] %s28_s19 }
   0x4   :  { %s1006_s20 = scalar_lea.vmem %s29_s19, 6272  ;;  %p1011_p1 = scmp.lt.s32.totalorder %s29_s19, %s29_s19 }
   0x5   :  { %p1007_p0 = scmp.ne.s32.totalorder %s29_s19, %s1006_s20  ;;  %p1012_p2 = scmp.lt.s32.totalorder %s1006_s20, %s1006_s20 }
   0x7   :  { %p1013_p3 = por %p1012_p2, %p1011_p1 }
   0x9   :  { %p1014_p4 = pnand %p1013_p3, %p1007_p0 }
   0xb   :  { %1017 = shalt.err (!%p1014_p4)
}
   0xc   :  { %s1085_s21 = smov 64   ;;  %s1086_s22 = smov 4  }
   0xd   :  { %34 = dma.hbm_to_vmem [thread:$0]  %s1154_s1, 6272, %s29_s19, [#allocation6], %s1085_s21, %s1085_s21, %s1086_s22  }
   0xe   :  { %s1087_s25 = smov [#allocation2]   ;;  %s1088_s27 = smov [#allocation7]  }
   0xf   :  { %s19_s26 = sshll.u32 %s1087_s25, 4  ;;  %s42_s28 = sshll.u32 %s1088_s27, 4  ;;  %s20_s26 = int_to_ptr.vmem [resolvable:$true] %s19_s26  ;;  %s43_s28 = int_to_ptr.vmem [resolvable:$true] %s42_s28 }
  0x10   :  { %s1026_s29 = scalar_lea.vmem %s20_s26, 896  ;;  %p1031_p6 = scmp.lt.s32.totalorder %s20_s26, %s20_s26 }
  0x11   :  { %p1027_p5 = scmp.ne.s32.totalorder %s20_s26, %s1026_s29  ;;  %p1032_p7 = scmp.lt.s32.totalorder %s1026_s29, %s1026_s29 }
  0x13   :  { %p1033_p8 = por %p1032_p7, %p1031_p6 }
  0x15   :  { %p1034_p9 = pnand %p1033_p8, %p1027_p5 }
  0x17   :  { %1037 = shalt.err (!%p1034_p9)
}
  0x18   :  { %22 = dma.hbm_to_vmem [thread:$0]  %s1153_s0, 896, %s20_s26, [#allocation3]  }
  0x19   :  { %s1046_s7 = scalar_lea.vmem %s43_s28, 1024  ;;  %p1051_p11 = scmp.lt.s32.totalorder %s43_s28, %s43_s28 }
  0x1a   :  { %p1047_p10 = scmp.ne.s32.totalorder %s43_s28, %s1046_s7  ;;  %p1052_p12 = scmp.lt.s32.totalorder %s1046_s7, %s1046_s7 }
  0x1c   :  { %p1053_p13 = por %p1052_p12, %p1051_p11 }
  0x1e   :  { %p1054_p0 = pnand %p1053_p13, %p1047_p10 }
  0x20   :  { %1057 = shalt.err (!%p1054_p0)
}
  0x21   :  { %48 = dma.hbm_to_vmem [thread:$0]  %s1156_s3, 1024, %s43_s28, [#allocation6], %s1085_s21, %s1085_s21, %s1086_s22  }
  0x22   :  { %1078 = dma.done.wait [#allocation3], 896  }
  0x23   :  { %1079 = vsyncadd [#allocation3], 4294966400 }
  0x24   :  { %1080 = dma.done.wait [#allocation6], 7296  }
  0x25   :  { %1081 = vsyncadd [#allocation6], 4294960000  ;;  %v941_v0 = vld [vmem:[#allocation5 + $0x78] sm:$0xff]   ;;  %v945_v4 = vld [vmem:[#allocation5 + $0x70] sm:$0xff]   ;;  %v1089_v44 = vmov 0.0   ;;  %vm1090_vm0 = vmmov 0  }
  0x26   :  { %v942_v1 = vld [vmem:[#allocation5 + $0x38] sm:$0xff]   ;;  %830 = vmatprep.subr.bf16.mxu0 %v941_v0  ;;  %v946_v5 = vld [vmem:[#allocation5 + $0x30] sm:$0xff]   ;;  %v949_v8 = vld [vmem:[#allocation5 + $0x68] sm:$0xff]   ;;  %vm474_vm1 = vcmask 130048  }
  0x27   :  { %v943_v2 = vld [vmem:[#allocation5 + $0xf8] sm:$0xff]   ;;  %831 = vmatpush3.bf16.msra.mxu0 %v942_v1  ;;  %v947_v6 = vld [vmem:[#allocation5 + $0xf0] sm:$0xff]   ;;  %v950_v9 = vld [vmem:[#allocation5 + $0x28] sm:$0xff]  }
  0x28   :  { %v944_v3 = vld [vmem:[#allocation5 + $0xb8] sm:$0xff]   ;;  %852 = vmatprep.subr.bf16.mxu1 %v943_v2  ;;  %832 = vmatprep.subr.bf16.mxu0 %v945_v4  ;;  %v948_v7 = vld [vmem:[#allocation5 + $0xb0] sm:$0xff]   ;;  %v951_v10 = vld [vmem:[#allocation5 + $0xe8] sm:$0xff]  }
  0x29   :  { %853 = vmatpush3.bf16.msra.mxu1 %v944_v3  ;;  %v952_v11 = vld [vmem:[#allocation5 + $0xa8] sm:$0xff]   ;;  %v953_v12 = vld [vmem:[#allocation5 + $0x60] sm:$0xff]   ;;  %v957_v16 = vld [vmem:[#allocation5 + $0x58] sm:$0xff]  }
  0x2a   :  { %854 = vmatprep.subr.bf16.mxu1 %v947_v6  ;;  %v954_v13 = vld [vmem:[#allocation5 + $0x20] sm:$0xff]   ;;  %v958_v17 = vld [vmem:[#allocation5 + $0x18] sm:$0xff]   ;;  %v961_v20 = vld [vmem:[#allocation5 + $0x50] sm:$0xff]  }
  0x2b   :  { %833 = vmatpush3.bf16.msra.mxu0 %v946_v5  ;;  %v955_v14 = vld [vmem:[#allocation5 + $0xe0] sm:$0xff]   ;;  %v959_v18 = vld [vmem:[#allocation5 + $0xd8] sm:$0xff]   ;;  %v962_v21 = vld [vmem:[#allocation5 + $0x10] sm:$0xff]  }
  0x2c   :  { %834 = vmatprep.subr.bf16.mxu0 %v949_v8  ;;  %v956_v15 = vld [vmem:[#allocation5 + $0xa0] sm:$0xff]   ;;  %v960_v19 = vld [vmem:[#allocation5 + $0x98] sm:$0xff]   ;;  %v963_v22 = vld [vmem:[#allocation5 + $0xd0] sm:$0xff]  }
  0x2d   :  { %855 = vmatpush3.bf16.msra.mxu1 %v948_v7  ;;  %v964_v23 = vld [vmem:[#allocation5 + $0x90] sm:$0xff]   ;;  %v965_v24 = vld [vmem:[#allocation5 + $0x48] sm:$0xff]   ;;  %v969_v28 = vld [vmem:[#allocation5 + $0x40] sm:$0xff]  }
  0x2e   :  { %856 = vmatprep.subr.bf16.mxu1 %v951_v10  ;;  %v966_v25 = vld [vmem:[#allocation5 + $0x8] sm:$0xff]   ;;  %v970_v29 = vld [vmem:[#allocation5] sm:$0xff]   ;;  %v62_v31 = vld [vmem:[#allocation2 + $0x8] sm:$0xff] }
  0x2f   :  { %835 = vmatpush3.bf16.msra.mxu0 %v950_v9  ;;  %v967_v26 = vld [vmem:[#allocation5 + $0xc8] sm:$0xff]   ;;  %v971_v30 = vld [vmem:[#allocation5 + $0xc0] sm:$0xff]   ;;  %v69_v32 = vpack.c.bf16 %v62_v31, %v62_v31  ;;  %v973_v36 = vld [vmem:[#allocation5 + $0x178] sm:$0xff]  }
  0x30   :  { %836 = vmatprep.subr.bf16.mxu0 %v953_v12  ;;  %v968_v27 = vld [vmem:[#allocation5 + $0x88] sm:$0xff]   ;;  %v972_v33 = vld [vmem:[#allocation5 + $0x80] sm:$0xff]   ;;  %v974_v39 = vld [vmem:[#allocation5 + $0x138] sm:$0xff]  }
  0x31   :  { %857 = vmatpush3.bf16.msra.mxu1 %v952_v11  ;;  %v61_v34 = vld [vmem:[#allocation2] sm:$0xff]  ;;  %v64_v37 = vld [vmem:[#allocation2 + $0x18] sm:$0xff]  ;;  %510 = vmatprep.mubr.bf16.mxu0 %v69_v32  ;;  %v63_v40 = vld [vmem:[#allocation2 + $0x10] sm:$0xff] }
  0x32   :  { %858 = vmatprep.subr.bf16.mxu1 %v955_v14  ;;  %v68_v35 = vpack.c.bf16 %v61_v34, %v61_v34  ;;  %v71_v38 = vpack.c.bf16 %v64_v37, %v64_v37  ;;  %v70_v41 = vpack.c.bf16 %v63_v40, %v63_v40  ;;  %v975_v42 = vld [vmem:[#allocation5 + $0x170] sm:$0xff]   ;;  %v977_v45 = vld [vmem:[#allocation5 + $0x168] sm:$0xff]   ;;  %v979_v47 = vld [vmem:[#allocation5 + $0x160] sm:$0xff]  }
  0x33   :  { %837 = vmatpush3.bf16.msra.mxu0 %v954_v13  ;;  %v976_v43 = vld [vmem:[#allocation5 + $0x130] sm:$0xff]   ;;  %v978_v46 = vld [vmem:[#allocation5 + $0x128] sm:$0xff]   ;;  %v980_v48 = vld [vmem:[#allocation5 + $0x120] sm:$0xff]  }
  0x34   :  { %838 = vmatprep.subr.bf16.mxu0 %v957_v16  ;;  %550 = vmatprep.mubr.bf16.mxu1 %v71_v38  ;;  %v981_v49 = vld [vmem:[#allocation5 + $0x158] sm:$0xff]   ;;  %v983_v51 = vld [vmem:[#allocation5 + $0x150] sm:$0xff]   ;;  %v989_v53 = vld [vmem:[#allocation5 + $0x180] sm:$0xff]  }
  0x35   :  { %859 = vmatpush3.bf16.msra.mxu1 %v956_v15  ;;  %v982_v50 = vld [vmem:[#allocation5 + $0x118] sm:$0xff]   ;;  %v984_v52 = vld [vmem:[#allocation5 + $0x110] sm:$0xff]   ;;  %v985_v55 = vld [vmem:[#allocation5 + $0x148] sm:$0xff]  }
  0x36   :  { %860 = vmatprep.subr.bf16.mxu1 %v959_v18  ;;  %v66_v54 = vld [vmem:[#allocation2 + $0x28] sm:$0xff]  ;;  %v67_v57 = vld [vmem:[#allocation2 + $0x30] sm:$0xff]  ;;  %v986_v59 = vld [vmem:[#allocation5 + $0x108] sm:$0xff]  }
  0x37   :  { %839 = vmatpush3.bf16.msra.mxu0 %v958_v17  ;;  %v73_v56 = vpack.c.bf16 %v66_v54, %v66_v54  ;;  %v74_v58 = vpack.c.bf16 %v67_v57, %v67_v57  ;;  %v987_v60 = vld [vmem:[#allocation5 + $0x140] sm:$0xff]   ;;  %v65_v62 = vld [vmem:[#allocation2 + $0x20] sm:$0xff]  ;;  %v991_v1 = vld [vmem:[#allocation7 + $0x30] sm:$0xff]  }
  0x38   :  { %840 = vmatprep.subr.bf16.mxu0 %v961_v20  ;;  %v988_v61 = vld [vmem:[#allocation5 + $0x100] sm:$0xff]   ;;  %v72_v63 = vpack.c.bf16 %v65_v62, %v65_v62  ;;  %v992_v2 = vld [vmem:[#allocation7 + $0x28] sm:$0xff]   ;;  %v993_v3 = vld [vmem:[#allocation7 + $0x20] sm:$0xff]  }
  0x39   :  { %861 = vmatpush3.bf16.msra.mxu1 %v960_v19  ;;  %v990_v0 = vld [vmem:[#allocation7 + $0x38] sm:$0xff]   ;;  %v995_v5 = vld [vmem:[#allocation7 + $0x10] sm:$0xff]   ;;  %v996_v6 = vld [vmem:[#allocation7 + $0x8] sm:$0xff]  }
  0x3a   :  { %862 = vmatprep.subr.bf16.mxu1 %v963_v22  ;;  %v994_v4 = vld [vmem:[#allocation7 + $0x18] sm:$0xff]   ;;  %v997_v7 = vld [vmem:[#allocation7] sm:$0xff]  }
  0x3b   :  { %841 = vmatpush3.bf16.msra.mxu0 %v962_v21  ;;  %v770_v21 = vld [vmem:[%s1155_s2] ss:$0 sm:$0xff]  ;;  %s1091_s2 = smov [#allocation8]  }
  0x3c   :  { %842 = vmatprep.subr.bf16.mxu0 %v965_v24  ;;  %v821_v34 = vld [vmem:[%s1157_s4] ss:$0 sm:$0xff]  ;;  %s760_s11 = sshll.u32 %s1091_s2, 4  ;;  %s761_s11 = int_to_ptr.vmem [resolvable:$true] %s760_s11 }
  0x3d   :  { %863 = vmatpush3.bf16.msra.mxu1 %v964_v23  ;;  %s1058_s12 = scalar_lea.vmem %s761_s11, 64  ;;  %p1063_p2 = scmp.lt.s32.totalorder %s761_s11, %s761_s11 }
  0x3e   :  { %864 = vmatprep.subr.bf16.mxu1 %v967_v26  ;;  %p1059_p1 = scmp.ne.s32.totalorder %s761_s11, %s1058_s12  ;;  %p1064_p3 = scmp.lt.s32.totalorder %s1058_s12, %s1058_s12 }
  0x3f   :  { %843 = vmatpush3.bf16.msra.mxu0 %v966_v25 }
  0x40   :  { %844 = vmatprep.subr.bf16.mxu0 %v969_v28  ;;  %p1065_p4 = por %p1064_p3, %p1063_p2 }
  0x41   :  { %865 = vmatpush3.bf16.msra.mxu1 %v968_v27 }
  0x42   :  { %866 = vmatprep.subr.bf16.mxu1 %v971_v30  ;;  %p1066_p5 = pnand %p1065_p4, %p1059_p1 }
  0x43   :  { %845 = vmatpush3.bf16.msra.mxu0 %v970_v29 }
  0x44   :  { %874 = vmatprep.subr.bf16.mxu0 %v973_v36 }
  0x45   :  { %867 = vmatpush3.bf16.msra.mxu1 %v972_v33 }
  0x46   :  { %511 = vmatmul.mubr.bf16.vlgmr.msra.gmra.mxu0 %v68_v35  ;;  %907 = vmatprep.subr.bf16.mxu1 %v1089_v44 }
  0x47   :  { %875 = vmatpush3.bf16.msra.mxu0 %v974_v39  ;;  %590 = vmatprep.mubr.bf16.mxu0 %v73_v56 }
  0x48   :  { %551 = vmatmul.mubr.bf16.vlgmr.msra.gmra.mxu1 %v70_v41  ;;  %876 = vmatprep.subr.bf16.mxu0 %v975_v42 }
  0x49   :  { %909 = vmatprep.mubr.msk.bf16.mxu1 %vm1090_vm0, %v1089_v44  ;;  %908 = vmatpush3.bf16.msra.mxu1 %v989_v53 }
  0x4a   :  { %913 = vmatprep.subr.bf16.mxu1 %v1089_v44 }
  0x4b   :  { %877 = vmatpush3.bf16.msra.mxu0 %v976_v43 }
  0x4c   :  { %878 = vmatprep.subr.bf16.mxu0 %v977_v45 }
  0x4f   :  { %879 = vmatpush3.bf16.msra.mxu0 %v978_v46 }
  0x50   :  { %880 = vmatprep.subr.bf16.mxu0 %v979_v47  ;;  %910 = vmatmul.mubr.msk.bf16.vlgmr.msra.gmra.mxu1 %vm474_vm1, %v74_v58 }
  0x51   :  { %929 = vmatprep.mubr.msk.bf16.mxu1 %vm1090_vm0, %v1089_v44  ;;  %914 = vmatpush3.bf16.msra.mxu1 %v990_v0 }
  0x52   :  { %915 = vmatprep.subr.bf16.mxu1 %v1089_v44 }
  0x53   :  { %881 = vmatpush3.bf16.msra.mxu0 %v980_v48 }
  0x54   :  { %882 = vmatprep.subr.bf16.mxu0 %v981_v49 }
  0x55   :  { %916 = vmatpush3.bf16.msra.mxu1 %v991_v1 }
  0x56   :  { %917 = vmatprep.subr.bf16.mxu1 %v1089_v44 }
  0x57   :  { %883 = vmatpush3.bf16.msra.mxu0 %v982_v50 }
  0x58   :  { %884 = vmatprep.subr.bf16.mxu0 %v983_v51 }
  0x59   :  { %918 = vmatpush3.bf16.msra.mxu1 %v992_v2 }
  0x5a   :  { %919 = vmatprep.subr.bf16.mxu1 %v1089_v44 }
  0x5b   :  { %885 = vmatpush3.bf16.msra.mxu0 %v984_v52 }
  0x5c   :  { %886 = vmatprep.subr.bf16.mxu0 %v985_v55 }
  0x5d   :  { %920 = vmatpush3.bf16.msra.mxu1 %v993_v3 }
  0x5e   :  { %921 = vmatprep.subr.bf16.mxu1 %v1089_v44 }
  0x5f   :  { %887 = vmatpush3.bf16.msra.mxu0 %v986_v59 }
  0x60   :  { %888 = vmatprep.subr.bf16.mxu0 %v987_v60 }
  0x61   :  { %922 = vmatpush3.bf16.msra.mxu1 %v994_v4 }
  0x62   :  { %923 = vmatprep.subr.bf16.mxu1 %v1089_v44 }
  0x63   :  { %889 = vmatpush3.bf16.msra.mxu0 %v988_v61 }
  0x65   :  { %924 = vmatpush3.bf16.msra.mxu1 %v995_v5 }
  0x66   :  { %591 = vmatmul.mubr.bf16.vlgmr.msra.gmra.mxu0 %v72_v63  ;;  %925 = vmatprep.subr.bf16.mxu1 %v1089_v44 }
  0x69   :  { %926 = vmatpush3.bf16.msra.mxu1 %v996_v6 }
  0x6a   :  { %927 = vmatprep.subr.bf16.mxu1 %v1089_v44 }
  0x6d   :  { %928 = vmatpush3.bf16.msra.mxu1 %v997_v7 }
 0x106   :  { %v846_v8 = vpop.f32.mrf.mxu0 }
 0x108   :  { %v847_v9 = vpop.f32.mrf.mxu0  ;;  %v868_v10 = vpop.f32.mrf.mxu1 }
 0x109   :  { %v848_v20 = vadd.f32 %v847_v9, %v846_v8 }
 0x10a   :  { %v849_v11 = vpop.f32.mrf.mxu0  ;;  %v869_v12 = vpop.f32.mrf.mxu1 }
 0x10b   :  { %v513_v22 = vadd.f32 %v848_v20, %v770_v21  ;;  %v870_v23 = vadd.f32 %v869_v12, %v868_v10 }
 0x10c   :  { %v850_v13 = vpop.f32.mrf.mxu0  ;;  %v871_v14 = vpop.f32.mrf.mxu1 }
 0x10d   :  { %v553_v26 = vadd.f32 %v870_v23, %v513_v22 }
 0x10e   :  { %v872_v15 = vpop.f32.mrf.mxu1 }
 0x110   :  { %v632_v16 = vpop.f32.mrf.mxu1 }
 0x112   :  { %v911_v17 = vpop.f32.mrf.mxu1 }
 0x114   :  { %v635_v18 = vpop.f32.mrf.mxu1 }
 0x116   :  { %v912_v19 = vpop.f32.mrf.mxu1 }
 0x126   :  { %v890_v24 = vpop.f32.mrf.mxu0 }
 0x128   :  { %v891_v25 = vpop.f32.mrf.mxu0 }
 0x129   :  { %v892_v27 = vadd.f32 %v891_v25, %v890_v24 }
 0x12a   :  { %v893_v28 = vpop.f32.mrf.mxu0 }
 0x12b   :  { %v593_v29 = vadd.f32 %v892_v27, %v553_v26 }
 0x12c   :  { %v894_v30 = vpop.f32.mrf.mxu0 }
 0x12d   :  { %v633_v31 = vadd.f32 %v632_v16, %v593_v29 }
 0x12f   :  { %v638_v32 = vmax.f32 %v633_v31, 0.0 }
 0x131   :  { %v639_v33 = vpack.c.bf16 %v638_v32, %v638_v32 }
 0x133   :  { %930 = vmatmul.mubr.bf16.vlgmr.msra.gmra.mxu1 %v639_v33 }
 0x1f3   :  { %v745_v35 = vpop.f32.mrf.mxu1 }
 0x1f4   :  { %v746_v36 = vadd.f32 %v821_v34, %v745_v35 }
 0x1f5   :  { %v931_v37 = vpop.f32.mrf.mxu1 }
 0x1f6   :  { %v751_v38 = vmax.f32 %v746_v36, 0.0 }
 0x1f7   :  { %v748_v39 = vpop.f32.mrf.mxu1 }
 0x1f8   :  { %v752_v40 = vpack.c.bf16 %v751_v38, %v751_v38 }
 0x1f9   :  { %v932_v41 = vpop.f32.mrf.mxu1 }
 0x1fa   :  { %753 = vst [vmem:[#allocation8] sm:$0xf] %v752_v40 }
 0x1fb   :  { %1069 = shalt.err (!%p1066_p5)
}
 0x1fc   :  { %763 = dma.vmem_to_hbm [thread:$0]  %s761_s11, 64, %s1158_s5, [#allocation4]  }
 0x1fd   :  { %1082 = dma.done.wait [#allocation4], 64  }
 0x1fe   :  { %1083 = vsyncadd [#allocation4], 4294967232 }
 0x1ff   :  { %767 = vsyncpa [#allocation3], 1 }
 0x200   :  { %768 = vsyncpa [#allocation6], 1 }
 0x201   :  { %769 = vsyncpa [#allocation4], 1 }

</bundles_post_ra>
